<compile_context>
chip_gen: v7x
topology: tpu7x:2x2x1
jax: 0.10.0
libtpu: 0.0.40
codegen_flags: <defaults>
</compile_context>

<pallas_src>
import math

import jax
import jax.numpy as jnp
from jax.experimental import pallas as pl
from jax.experimental.pallas import tpu as pltpu


_INV_SQRT2 = 1.0 / math.sqrt(2.0)


def _round_up(x, m):
    return ((x + m - 1) // m) * m


def _vmem_capacity_bytes():
    """Physical per-core VMEM capacity (with device-kind fallback)."""
    try:
        return int(pltpu.get_tpu_info().vmem_capacity_bytes)
    except Exception:
        pass
    try:
        if "v7" in jax.devices()[0].device_kind.lower():
            return 64 << 20
    except Exception:
        pass
    return 128 << 20


def _default_tile_m():
    """Per-generation token-tile default (weight-reuse vs. HBM roofline)."""
    try:
        kind = jax.devices()[0].device_kind.lower()
    except Exception:
        kind = ""
    if "v5" in kind:
        return 256          # v5e: ~240 flops/B roofline already met at 256
    if "v6" in kind:
        return 768          # v6e: needs ~650-700 flops/B of weight reuse
    return 512              # v7x / unknown: ~310 flops/B, 64 MiB VMEM budget


def _is_multi_tensorcore():
    try:
        return "v7" in jax.devices()[0].device_kind.lower()
    except Exception:
        return False


def _largest_tile(dim_p, cap):
    """Largest multiple of 128 that divides dim_p and is <= cap.
    dim_p is always a multiple of 128."""
    if dim_p <= cap:
        return dim_p
    d = (cap // 128) * 128
    while d > 128:
        if dim_p % d == 0:
            return d
        d -= 128
    return 128


def mlp_kernel(x_ref, w1_ref, b1_ref, w2_ref, b2_ref, o_ref, acc_ref):
    h_idx = pl.program_id(2)

    # Initialise the accumulator with the broadcast fc2 bias (drops the
    # epilogue bias add).
    @pl.when(h_idx == 0)
    def _():
        acc_ref[...] = jnp.broadcast_to(
            b2_ref[...].astype(jnp.float32), acc_ref.shape)

    # fc1 partial: (tm, in) @ (in, th) -> (tm, th), f32 accumulation on MXU.
    h = jnp.dot(x_ref[...], w1_ref[...], preferred_element_type=jnp.float32)
    h = h + b1_ref[...].astype(jnp.float32)
    # Exact (erf-based) GELU, matching torch.nn.GELU() default.
    h = 0.5 * h * (1.0 + jax.lax.erf(h * _INV_SQRT2))
    # Dropout(p=0.0) is the identity -> nothing to do.
    # fc2 partial sum over this hidden tile (cast back to the MXU dtype).
    acc_ref[...] += jnp.dot(h.astype(w2_ref.dtype), w2_ref[...],
                            preferred_element_type=jnp.float32)

    @pl.when(h_idx == pl.num_programs(2) - 1)
    def _():
        o_ref[...] = acc_ref[...].astype(o_ref.dtype)


def mlp_prepare_params(w1, b1, w2, b2, *, compute_dtype=jnp.bfloat16):
    """Pad feature dims to multiples of 128 and cast weights to the MXU
    compute dtype ONCE.  Call at parameter-load time and reuse across forward
    calls (avoids re-copying the weight matrices in HBM every call)."""
    in_f, hid = w1.shape
    hid2, out_f = w2.shape
    assert hid2 == hid and b1.shape == (hid,) and b2.shape == (out_f,)

    in_p = _round_up(in_f, 128)
    hid_p = _round_up(hid, 128)
    out_p = _round_up(out_f, 128)

    def _pad2(a, rp, cp):
        r, c = a.shape
        if rp != r or cp != c:
            a = jnp.pad(a, ((0, rp - r), (0, cp - c)))
        return a

    w1p = _pad2(w1, in_p, hid_p).astype(compute_dtype)
    w2p = _pad2(w2, hid_p, out_p).astype(compute_dtype)
    b1p = _pad2(b1.astype(jnp.float32).reshape(1, hid), 1, hid_p)
    b2p = _pad2(b2.astype(jnp.float32).reshape(1, out_f), 1, out_p)

    return dict(w1=w1p, b1=b1p, w2=w2p, b2=b2p,
                in_f=in_f, hid=hid, out_f=out_f, compute_dtype=compute_dtype)


def mlp_pallas(x, w1=None, b1=None, w2=None, b2=None, *,
               params=None, compute_dtype=jnp.bfloat16):
    """x: (..., in_features) -> (..., out_features).

    Weights are nn.Linear parameters stored transposed:
      w1: (in, hidden), b1: (hidden,), w2: (hidden, out), b2: (out,)
    Pass a pre-built `params` dict from mlp_prepare_params for repeated calls.
    """
    if params is None:
        params = mlp_prepare_params(w1, b1, w2, b2, compute_dtype=compute_dtype)

    w1p, b1p, w2p, b2p = params["w1"], params["b1"], params["w2"], params["b2"]
    in_f, hid, out_f = params["in_f"], params["hid"], params["out_f"]
    cdt = params["compute_dtype"]
    in_p, hid_p = w1p.shape
    out_p = w2p.shape[1]

    lead = x.shape[:-1]
    assert x.shape[-1] == in_f
    out_dtype = x.dtype
    x2d = x.reshape(-1, in_f)
    if x2d.dtype != cdt:
        x2d = x2d.astype(cdt)
    m = x2d.shape[0]

    # ------------------- device-aware tile plan -------------------
    csz = jnp.dtype(cdt).itemsize
    osz = jnp.dtype(out_dtype).itemsize
    cap = _vmem_capacity_bytes()
    budget = int(cap * 0.75)

    m_al = _round_up(max(m, 1), 128)
    tm = min(_default_tile_m(), m_al)
    th = _largest_tile(hid_p, 512)
    tn = _largest_tile(out_p, 512)

    def _need(tm_, th_, tn_):
        # Conservative: every stream double-buffered + f32 accumulator.
        return (2 * tm_ * in_p * csz
                + 2 * in_p * th_ * csz + 2 * th_ * 4
                + 2 * th_ * tn_ * csz + 2 * tn_ * 4
                + 2 * tm_ * tn_ * osz
                + tm_ * tn_ * 4)

    while _need(tm, th, tn) > budget:
        if th > 128:
            th = _largest_tile(hid_p, th - 128)
        elif tn > 128:
            tn = _largest_tile(out_p, tn - 128)
        elif tm > 128:
            tm -= 128
        else:
            break

    n_n = out_p // tn
    n_h = hid_p // th

    # v7x has 2 TensorCores: guarantee >= 2 parallel tiles when there would
    # otherwise be a single (token, out-feature) tile.
    if _is_multi_tensorcore() and n_n == 1 and m_al >= 256 and tm >= m_al:
        tm = _round_up(m_al // 2, 128)

    # ---------- activation padding (only when actually required) ----------
    pad_in = in_p - in_f
    if pad_in > 0:
        # Feature (K-dim) zero-padding is required for correctness; fold the
        # token padding into the same single pad.
        m_p = _round_up(m, tm)
        x2d = jnp.pad(x2d, ((0, m_p - m), (0, pad_in)))
    else:
        m_p = m                      # ragged token tail handled by the grid
    grid_m = pl.cdiv(m_p, tm)

    vmem_needed = _need(tm, th, tn)
    vmem_limit = int(min(cap, max(16 << 20, int(vmem_needed * 1.3) + (2 << 20))))

    # Advisory cost, including weight re-streaming across token/out tiles.
    cost = pl.CostEstimate(
        flops=2 * grid_m * tm * in_p * hid_p + 2 * grid_m * tm * hid_p * out_p,
        transcendentals=grid_m * tm * hid_p,
        bytes_accessed=int(
            grid_m * tm * in_p * csz                             # x
            + grid_m * n_n * (in_p * hid_p * csz + hid_p * 4)    # w1 + b1
            + grid_m * (hid_p * out_p * csz + out_p * 4)         # w2 + b2
            + grid_m * tm * out_p * osz),                        # output
    )

    # x's block only changes when the token tile changes -> single-buffer it
    # when the hidden axis is pipelined (saves tm*in_p*csz of VMEM headroom).
    if n_h > 1:
        x_spec = pl.BlockSpec((tm, in_p), lambda i, n, h: (i, 0),
                              pipeline_mode=pl.Buffered(1))
    else:
        x_spec = pl.BlockSpec((tm, in_p), lambda i, n, h: (i, 0))

    out2d = pl.pallas_call(
        mlp_kernel,
        out_shape=jax.ShapeDtypeStruct((m_p, out_p), out_dtype),
        grid_spec=pltpu.PrefetchScalarGridSpec(
            num_scalar_prefetch=0,
            grid=(grid_m, n_n, n_h),   # (token tiles, out tiles, hidden tiles)
            in_specs=[
                x_spec,                                              # x tile
                pl.BlockSpec((in_p, th), lambda i, n, h: (0, h)),    # w1 tile
                pl.BlockSpec((1, th), lambda i, n, h: (0, h)),       # b1 tile
                pl.BlockSpec((th, tn), lambda i, n, h: (h, n)),      # w2 tile
                pl.BlockSpec((1, tn), lambda i, n, h: (0, n)),       # b2 tile
            ],
            out_specs=pl.BlockSpec((tm, tn), lambda i, n, h: (i, n)),
            scratch_shapes=[pltpu.VMEM((tm, tn), jnp.float32)],
        ),
        compiler_params=pltpu.CompilerParams(
            dimension_semantics=("parallel", "parallel", "arbitrary"),
            vmem_limit_bytes=vmem_limit,
        ),
        cost_estimate=cost,
    )(x2d, w1p, b1p, w2p, b2p)

    if m_p != m or out_p != out_f:
        out2d = out2d[:m, :out_f]
    return out2d.reshape(*lead, out_f)


def mlp_reference(x, w1, b1, w2, b2):
    h = jnp.dot(x, w1) + b1
    h = 0.5 * h * (1.0 + jax.lax.erf(h * _INV_SQRT2))
    return jnp.dot(h, w2) + b2


if __name__ == "__main__":
    # Small shapes consistent with the module: tokens (batch=2, seq=8),
    # in_features=32, hidden_features=64, out_features=32 (defaults to in).
    batch, seq = 2, 8
    in_features, hidden_features = 32, 64
    out_features = in_features

    key = jax.random.PRNGKey(0)
    kx, k1, k2, k3, k4 = jax.random.split(key, 5)

    x = jax.random.normal(kx, (batch, seq, in_features), dtype=jnp.float32)

    # Deterministic synthetic parameters (nn.Linear-shaped, stored transposed).
    w1 = jax.random.normal(k1, (in_features, hidden_features),
                           dtype=jnp.float32) * (1.0 / math.sqrt(in_features))
    b1 = jax.random.normal(k2, (hidden_features,), dtype=jnp.float32) * 0.1
    w2 = jax.random.normal(k3, (hidden_features, out_features),
                           dtype=jnp.float32) * (1.0 / math.sqrt(hidden_features))
    b2 = jax.random.normal(k4, (out_features,), dtype=jnp.float32) * 0.1

    ref = mlp_reference(x, w1, b1, w2, b2)

    # Fast path (default): bf16 MXU matmuls, f32 accumulation. Weight prep is
    # hoisted once via mlp_prepare_params (as it would be at load time).
    prepared = mlp_prepare_params(w1, b1, w2, b2, compute_dtype=jnp.bfloat16)
    out = jax.block_until_ready(mlp_pallas(x, params=prepared))
    assert out.shape == (batch, seq, out_features)
    assert out.dtype == x.dtype
    assert jnp.allclose(out, ref, atol=5e-2, rtol=5e-2)   # bf16-input tolerance

    # Exact f32 path: tight parity with the torch.nn module semantics.
    out_f32 = jax.block_until_ready(
        mlp_pallas(x, w1, b1, w2, b2, compute_dtype=jnp.float32))
    assert jnp.allclose(out_f32, ref, atol=1e-4, rtol=1e-4)

    print("KERNEL_OK")
</pallas_src>

<mosaic_0001>
module attributes {stable_mosaic.version = 11 : i64} {
  func.func @mlp_kernel(%arg0: i32, %arg1: i32, %arg2: i32, %arg3: memref<128x128xbf16, #tpu.memory_space<vmem>>, %arg4: memref<128x128xbf16, #tpu.memory_space<vmem>>, %arg5: memref<1x128xf32, #tpu.memory_space<vmem>>, %arg6: memref<128x128xbf16, #tpu.memory_space<vmem>>, %arg7: memref<1x128xf32, #tpu.memory_space<vmem>>, %arg8: memref<128x128xf32, #tpu.memory_space<vmem>>, %arg9: memref<128x128xf32, #tpu.memory_space<vmem>>) attributes {dimension_semantics = [#tpu.dimension_semantics<parallel>, #tpu.dimension_semantics<parallel>, #tpu.dimension_semantics<arbitrary>], iteration_bounds = array<i64: 1, 1, 1>, scalar_prefetch = 0 : i64, scratch_operands = 1 : i64, tpu.core_type = #tpu.core_type<tc>, window_params = [{transform_indices = @transform_0, window_bounds = array<i64: 128, 128>}, {transform_indices = @transform_1, window_bounds = array<i64: 128, 128>}, {transform_indices = @transform_2, window_bounds = array<i64: 1, 128>}, {transform_indices = @transform_3, window_bounds = array<i64: 128, 128>}, {transform_indices = @transform_4, window_bounds = array<i64: 1, 128>}, {transform_indices = @transform_5, window_bounds = array<i64: 128, 128>}]} {
    %c0_i32 = arith.constant 0 : i32
    %0 = arith.cmpi eq, %arg2, %c0_i32 : i32
    %1 = arith.extui %0 : i1 to i32
    %c0_i32_0 = arith.constant 0 : i32
    %2 = arith.cmpi ne, %1, %c0_i32_0 : i32
    scf.if %2 {
      %c0_18 = arith.constant 0 : index
      %c0_19 = arith.constant 0 : index
      %26 = vector.load %arg7[%c0_18, %c0_19] : memref<1x128xf32, #tpu.memory_space<vmem>>, vector<1x128xf32>
      %27 = vector.shape_cast %26 : vector<1x128xf32> to vector<1x128xf32>
      %28 = vector.broadcast %27 : vector<1x128xf32> to vector<128x128xf32>
      %c0_20 = arith.constant 0 : index
      %c0_21 = arith.constant 0 : index
      %29 = vector.load %arg9[%c0_20, %c0_21] : memref<128x128xf32, #tpu.memory_space<vmem>>, vector<128x128xf32>
      tpu.vector_store %arg9[%c0_20, %c0_21], %28 {strides = array<i32>} : memref<128x128xf32, #tpu.memory_space<vmem>>, vector<128x128xf32>,
    } else {
    }
    %c0 = arith.constant 0 : index
    %c0_1 = arith.constant 0 : index
    %3 = vector.load %arg3[%c0, %c0_1] : memref<128x128xbf16, #tpu.memory_space<vmem>>, vector<128x128xbf16>
    %c0_2 = arith.constant 0 : index
    %c0_3 = arith.constant 0 : index
    %4 = vector.load %arg4[%c0_2, %c0_3] : memref<128x128xbf16, #tpu.memory_space<vmem>>, vector<128x128xbf16>
    %cst = arith.constant dense<0.000000e+00> : vector<128x128xf32>
    %5 = tpu.matmul %3, %4, %cst {dimension_numbers = #tpu.dot_dimension_numbers<[1], [0], [0], [1], [0, 0, 1, 1], [], []>} : vector<128x128xbf16>, vector<128x128xbf16>, vector<128x128xf32> -> vector<128x128xf32>
    %c0_4 = arith.constant 0 : index
    %c0_5 = arith.constant 0 : index
    %6 = vector.load %arg5[%c0_4, %c0_5] : memref<1x128xf32, #tpu.memory_space<vmem>>, vector<1x128xf32>
    %7 = vector.broadcast %6 : vector<1x128xf32> to vector<128x128xf32>
    %8 = arith.addf %5, %7 : vector<128x128xf32>
    %cst_6 = arith.constant 5.000000e-01 : f32
    %9 = vector.broadcast %cst_6 : f32 to vector<128x128xf32>
    %10 = arith.mulf %9, %8 : vector<128x128xf32>
    %cst_7 = arith.constant 0.707106769 : f32
    %11 = vector.broadcast %cst_7 : f32 to vector<128x128xf32>
    %12 = arith.mulf %8, %11 : vector<128x128xf32>
    %13 = math.erf %12 : vector<128x128xf32>
    %cst_8 = arith.constant 1.000000e+00 : f32
    %14 = vector.broadcast %cst_8 : f32 to vector<128x128xf32>
    %15 = arith.addf %14, %13 : vector<128x128xf32>
    %16 = arith.mulf %10, %15 : vector<128x128xf32>
    %c0_9 = arith.constant 0 : index
    %c0_10 = arith.constant 0 : index
    %17 = vector.load %arg9[%c0_9, %c0_10] : memref<128x128xf32, #tpu.memory_space<vmem>>, vector<128x128xf32>
    %18 = arith.truncf %16 : vector<128x128xf32> to vector<128x128xbf16>
    %c0_11 = arith.constant 0 : index
    %c0_12 = arith.constant 0 : index
    %19 = vector.load %arg6[%c0_11, %c0_12] : memref<128x128xbf16, #tpu.memory_space<vmem>>, vector<128x128xbf16>
    %cst_13 = arith.constant dense<0.000000e+00> : vector<128x128xf32>
    %20 = tpu.matmul %18, %19, %cst_13 {dimension_numbers = #tpu.dot_dimension_numbers<[1], [0], [0], [1], [0, 0, 1, 1], [], []>} : vector<128x128xbf16>, vector<128x128xbf16>, vector<128x128xf32> -> vector<128x128xf32>
    %21 = arith.addf %17, %20 : vector<128x128xf32>
    %c0_14 = arith.constant 0 : index
    %c0_15 = arith.constant 0 : index
    %22 = vector.load %arg9[%c0_14, %c0_15] : memref<128x128xf32, #tpu.memory_space<vmem>>, vector<128x128xf32>
    tpu.vector_store %arg9[%c0_14, %c0_15], %21 {strides = array<i32>} : memref<128x128xf32, #tpu.memory_space<vmem>>, vector<128x128xf32>,
    %c0_i32_16 = arith.constant 0 : i32
    %23 = arith.cmpi eq, %arg2, %c0_i32_16 : i32
    %24 = arith.extui %23 : i1 to i32
    %c0_i32_17 = arith.constant 0 : i32
    %25 = arith.cmpi ne, %24, %c0_i32_17 : i32
    scf.if %25 {
      %c0_18 = arith.constant 0 : index
      %c0_19 = arith.constant 0 : index
      %26 = vector.load %arg9[%c0_18, %c0_19] : memref<128x128xf32, #tpu.memory_space<vmem>>, vector<128x128xf32>
      %c0_20 = arith.constant 0 : index
      %c0_21 = arith.constant 0 : index
      %27 = vector.load %arg8[%c0_20, %c0_21] : memref<128x128xf32, #tpu.memory_space<vmem>>, vector<128x128xf32>
      tpu.vector_store %arg8[%c0_20, %c0_21], %26 {strides = array<i32>} : memref<128x128xf32, #tpu.memory_space<vmem>>, vector<128x128xf32>,
    } else {
    }
    return
  }
  func.func @transform_0(%arg0: i32, %arg1: i32, %arg2: i32) -> (i32, i32) {
    %c0_i32 = arith.constant 0 : i32
    %c0_i32_0 = arith.constant 0 : i32
    return %arg0, %c0_i32 : i32, i32
  }
  func.func @transform_1(%arg0: i32, %arg1: i32, %arg2: i32) -> (i32, i32) {
    %c0_i32 = arith.constant 0 : i32
    %c0_i32_0 = arith.constant 0 : i32
    return %c0_i32, %arg2 : i32, i32
  }
  func.func @transform_2(%arg0: i32, %arg1: i32, %arg2: i32) -> (i32, i32) {
    %c0_i32 = arith.constant 0 : i32
    %c0_i32_0 = arith.constant 0 : i32
    return %c0_i32, %arg2 : i32, i32
  }
  func.func @transform_3(%arg0: i32, %arg1: i32, %arg2: i32) -> (i32, i32) {
    %c0_i32 = arith.constant 0 : i32
    return %arg2, %arg1 : i32, i32
  }
  func.func @transform_4(%arg0: i32, %arg1: i32, %arg2: i32) -> (i32, i32) {
    %c0_i32 = arith.constant 0 : i32
    %c0_i32_0 = arith.constant 0 : i32
    return %c0_i32, %arg1 : i32, i32
  }
  func.func @transform_5(%arg0: i32, %arg1: i32, %arg2: i32) -> (i32, i32) {
    %c0_i32 = arith.constant 0 : i32
    return %arg0, %arg1 : i32, i32
  }
}

</mosaic_0001>

<bundles_post_ra>
// kernel: tpu_custom_call.1
= control target key start
LH: loop header
LB: loop body
LE: loop exit
PB: predicated region body
PF: predicated region fallthrough
CT: control target
= control target key end

     0   :  { %10 = vsyncpa [#allocation4], 0  ;;  %s1086_s0 = inlined_call_operand.hbm [shape: bf16[128,128], index: 0, kind: input, shape index: {}]   ;;  %s1087_s1 = inlined_call_operand.hbm [shape: bf16[128,128], index: 1, kind: input, shape index: {}]   ;;  %s1088_s2 = inlined_call_operand.vmem [shape: f32[1,128], index: 2, kind: input, shape index: {}]   ;;  %s1089_s3 = inlined_call_operand.hbm [shape: bf16[128,128], index: 3, kind: input, shape index: {}]   ;;  %s1090_s4 = inlined_call_operand.vmem [shape: f32[1,128], index: 4, kind: input, shape index: {}]   ;;  %s1091_s5 = inlined_call_operand.hbm [shape: f32[128,128], index: 5, kind: output, shape index: {}]  }
   0x1   :  { %11 = vsyncpa [#allocation7], 0 }
   0x2   :  { %12 = vsyncpa [#allocation5], 0  ;;  %s952_s18 = smov [#allocation6]   ;;  %s953_s20 = smov [#allocation3]  }
   0x3   :  { %s30_s19 = sshll.u32 %s952_s18, 4  ;;  %s18_s21 = sshll.u32 %s953_s20, 4  ;;  %s31_s19 = int_to_ptr.vmem [resolvable:$true] %s30_s19  ;;  %s990_s21 = int_to_ptr.vmem [resolvable:$true] %s18_s21 }
   0x4   :  { %s858_s24 = scalar_lea.hbm %s1087_s1, 1024 }
   0x5   :  { %p859_p0 = scmp.ne.s32.totalorder %s1087_s1, %s858_s24  ;;  %p862_p1 = scmp.lt.u32.totalorder %s858_s24, %s1087_s1 }
   0x7   :  { %p864_p2 = pnand %p862_p1, %p859_p0 }
   0x9   :  { %867 = shalt.err (!%p864_p2)
}
   0xa   :  { %s868_s29 = scalar_lea.vmem %s31_s19, 1024  ;;  %p873_p4 = scmp.lt.s32.totalorder %s31_s19, %s31_s19 }
   0xb   :  { %p869_p3 = scmp.ne.s32.totalorder %s31_s19, %s868_s29  ;;  %p874_p5 = scmp.lt.s32.totalorder %s868_s29, %s868_s29 }
   0xd   :  { %p875_p6 = por %p874_p5, %p873_p4 }
   0xf   :  { %p876_p7 = pnand %p875_p6, %p869_p3 }
  0x11   :  { %879 = shalt.err (!%p876_p7)
}
  0x12   :  { %s954_s30 = smov 64   ;;  %s955_s6 = smov 4  }
  0x13   :  { %36 = dma.hbm_to_vmem [thread:$0]  %s1087_s1, 1024, %s31_s19, [#allocation7], %s954_s30, %s954_s30, %s955_s6  }
  0x14   :  { %s880_s11 = scalar_lea.hbm %s1086_s0, 1024 }
  0x15   :  { %p881_p8 = scmp.ne.s32.totalorder %s1086_s0, %s880_s11  ;;  %p884_p9 = scmp.lt.u32.totalorder %s880_s11, %s1086_s0 }
  0x17   :  { %p886_p10 = pnand %p884_p9, %p881_p8 }
  0x19   :  { %889 = shalt.err (!%p886_p10)
}
  0x1a   :  { %s890_s16 = scalar_lea.vmem %s990_s21, 1024  ;;  %p895_p12 = scmp.lt.s32.totalorder %s990_s21, %s990_s21 }
  0x1b   :  { %p891_p11 = scmp.ne.s32.totalorder %s990_s21, %s890_s16  ;;  %p896_p13 = scmp.lt.s32.totalorder %s890_s16, %s890_s16 }
  0x1d   :  { %p897_p0 = por %p896_p13, %p895_p12 }
  0x1f   :  { %p898_p1 = pnand %p897_p0, %p891_p11 }
  0x21   :  { %901 = shalt.err (!%p898_p1)
}
  0x22   :  { %24 = dma.hbm_to_vmem [thread:$0]  %s1086_s0, 1024, %s990_s21, [#allocation4], %s954_s30, %s954_s30, %s955_s6  }
  0x23   :  { %s956_s18 = smov [#allocation8]   ;;  %s902_s23 = scalar_lea.hbm %s1089_s3, 1024 }
  0x24   :  { %s44_s19 = sshll.u32 %s956_s18, 4  ;;  %p903_p2 = scmp.ne.s32.totalorder %s1089_s3, %s902_s23  ;;  %s45_s19 = int_to_ptr.vmem [resolvable:$true] %s44_s19 }
  0x25   :  { %p906_p3 = scmp.lt.u32.totalorder %s902_s23, %s1089_s3 }
  0x27   :  { %p908_p4 = pnand %p906_p3, %p903_p2 }
  0x29   :  { %911 = shalt.err (!%p908_p4)
}
  0x2a   :  { %s912_s28 = scalar_lea.vmem %s45_s19, 1024  ;;  %p917_p6 = scmp.lt.s32.totalorder %s45_s19, %s45_s19 }
  0x2b   :  { %p913_p5 = scmp.ne.s32.totalorder %s45_s19, %s912_s28  ;;  %p918_p7 = scmp.lt.s32.totalorder %s912_s28, %s912_s28 }
  0x2d   :  { %p919_p8 = por %p918_p7, %p917_p6 }
  0x2f   :  { %p920_p9 = pnand %p919_p8, %p913_p5 }
  0x31   :  { %923 = shalt.err (!%p920_p9)
}
  0x32   :  { %50 = dma.hbm_to_vmem [thread:$0]  %s1089_s3, 1024, %s45_s19, [#allocation7], %s954_s30, %s954_s30, %s955_s6  }
  0x33   :  { %946 = dma.done.wait [#allocation4], 1024  }
  0x34   :  { %947 = vsyncadd [#allocation4], 4294966272 }
  0x35   :  { %948 = dma.done.wait [#allocation7], 2048  }
  0x36   :  { %949 = vsyncadd [#allocation7], 4294965248  ;;  %v802_v0 = vld [vmem:[#allocation6] sm:$0xff]   ;;  %v803_v1 = vld [vmem:[#allocation6 + $0x8] sm:$0xff]  }
  0x37   :  { %730 = vmatprep.subr.bf16.mxu0 %v802_v0  ;;  %v804_v2 = vld [vmem:[#allocation6 + $0x10] sm:$0xff]   ;;  %v805_v3 = vld [vmem:[#allocation6 + $0x18] sm:$0xff]   ;;  %v810_v4 = vld [vmem:[#allocation3] sm:$0xff]  }
  0x38   :  { %731 = vmatpush3.bf16.msra.mxu0 %v802_v0  ;;  %746 = vmatprep.mubr.bf16.mxu0 %v810_v4  ;;  %v806_v5 = vld [vmem:[#allocation6 + $0x20] sm:$0xff]   ;;  %v807_v6 = vld [vmem:[#allocation6 + $0x28] sm:$0xff]   ;;  %v808_v9 = vld [vmem:[#allocation6 + $0x30] sm:$0xff]  }
  0x39   :  { %732 = vmatprep.subr.bf16.mxu0 %v803_v1  ;;  %v818_v7 = vld [vmem:[#allocation8] sm:$0xff]   ;;  %v819_v8 = vld [vmem:[#allocation8 + $0x8] sm:$0xff]   ;;  %v809_v10 = vld [vmem:[#allocation6 + $0x38] sm:$0xff]  }
  0x3a   :  { %762 = vmatprep.subr.bf16.mxu1 %v818_v7  ;;  %v811_v11 = vld [vmem:[#allocation3 + $0x8] sm:$0xff]   ;;  %v812_v12 = vld [vmem:[#allocation3 + $0x10] sm:$0xff]   ;;  %v813_v13 = vld [vmem:[#allocation3 + $0x18] sm:$0xff]  }
  0x3b   :  { %763 = vmatpush3.bf16.msra.mxu1 %v818_v7  ;;  %v814_v14 = vld [vmem:[#allocation3 + $0x20] sm:$0xff]   ;;  %v815_v15 = vld [vmem:[#allocation3 + $0x28] sm:$0xff]   ;;  %v816_v16 = vld [vmem:[#allocation3 + $0x30] sm:$0xff]  }
  0x3c   :  { %733 = vmatpush3.bf16.msra.mxu0 %v803_v1  ;;  %764 = vmatprep.subr.bf16.mxu1 %v819_v8  ;;  %v817_v17 = vld [vmem:[#allocation3 + $0x38] sm:$0xff]   ;;  %v820_v18 = vld [vmem:[#allocation8 + $0x10] sm:$0xff]   ;;  %v822_v20 = vld [vmem:[#allocation8 + $0x20] sm:$0xff]  }
  0x3d   :  { %734 = vmatprep.subr.bf16.mxu0 %v804_v2  ;;  %v821_v19 = vld [vmem:[#allocation8 + $0x18] sm:$0xff]   ;;  %v823_v21 = vld [vmem:[#allocation8 + $0x28] sm:$0xff]   ;;  %v824_v22 = vld [vmem:[#allocation8 + $0x30] sm:$0xff]  }
  0x3e   :  { %v825_v23 = vld [vmem:[#allocation8 + $0x38] sm:$0xff]   ;;  %v1045_v24 = vld [vmem:[%s1088_s2] ss:$0 sm:$0xff] }
  0x3f   :  { %765 = vmatpush3.bf16.msra.mxu1 %v819_v8 }
  0x40   :  { %735 = vmatpush3.bf16.msra.mxu0 %v804_v2  ;;  %766 = vmatprep.subr.bf16.mxu1 %v820_v18 }
  0x41   :  { %736 = vmatprep.subr.bf16.mxu0 %v805_v3 }
  0x43   :  { %767 = vmatpush3.bf16.msra.mxu1 %v820_v18 }
  0x44   :  { %737 = vmatpush3.bf16.msra.mxu0 %v805_v3  ;;  %768 = vmatprep.subr.bf16.mxu1 %v821_v19 }
  0x45   :  { %738 = vmatprep.subr.bf16.mxu0 %v806_v5 }
  0x47   :  { %769 = vmatpush3.bf16.msra.mxu1 %v821_v19 }
  0x48   :  { %739 = vmatpush3.bf16.msra.mxu0 %v806_v5  ;;  %770 = vmatprep.subr.bf16.mxu1 %v822_v20 }
  0x49   :  { %740 = vmatprep.subr.bf16.mxu0 %v807_v6 }
  0x4b   :  { %771 = vmatpush3.bf16.msra.mxu1 %v822_v20 }
  0x4c   :  { %741 = vmatpush3.bf16.msra.mxu0 %v807_v6  ;;  %772 = vmatprep.subr.bf16.mxu1 %v823_v21 }
  0x4d   :  { %742 = vmatprep.subr.bf16.mxu0 %v808_v9 }
  0x4f   :  { %773 = vmatpush3.bf16.msra.mxu1 %v823_v21 }
  0x50   :  { %743 = vmatpush3.bf16.msra.mxu0 %v808_v9  ;;  %774 = vmatprep.subr.bf16.mxu1 %v824_v22 }
  0x51   :  { %744 = vmatprep.subr.bf16.mxu0 %v809_v10 }
  0x53   :  { %775 = vmatpush3.bf16.msra.mxu1 %v824_v22 }
  0x54   :  { %745 = vmatpush3.bf16.msra.mxu0 %v809_v10  ;;  %776 = vmatprep.subr.bf16.mxu1 %v825_v23 }
  0x57   :  { %747 = vmatmul.mubr.bf16.vlgmr.msra.gmra.mrb[0].mxu0 %v811_v11  ;;  %777 = vmatpush3.bf16.msra.mxu1 %v825_v23 }
  0x58   :  { %750 = vmatprep.mubr.bf16.mxu0 %v812_v12 }
  0x5f   :  { %751 = vmatmul.mubr.bf16.gmra.mrb[4].mxu0 %v813_v13 }
  0x60   :  { %754 = vmatprep.mubr.bf16.mxu0 %v814_v14 }
  0x67   :  { %755 = vmatmul.mubr.bf16.gmra.mrb[8].mxu0 %v815_v15 }
  0x68   :  { %758 = vmatprep.mubr.bf16.mxu0 %v816_v16 }
  0x6f   :  { %759 = vmatmul.mubr.bf16.gmra.mrb[12].mxu0 %v817_v17 }
 0x12a   :  { %v748_v25 = vpop.f32.mrb[0].mxu0 }
 0x12b   :  { %v268_v26 = vadd.f32 %v748_v25, %v1045_v24  ;;  %v259_v27 = vpop.f32.mrb[1].mxu0 }
 0x12c   :  { %v260_v28 = vadd.f32 %v1045_v24, %v259_v27  ;;  %v749_v29 = vpop.f32.mrb[2].mxu0 }
 0x12d   :  { %v340_v30 = vmul.f32 0.70710677, %v268_v26  ;;  %v271_v31 = vadd.f32 %v749_v29, %v1045_v24  ;;  %v262_v32 = vpop.f32.mrb[3].mxu0  ;;  %v324_v53 = vmul.f32 0.5, %v268_v26 }
 0x12e   :  { %v338_v33 = vmul.f32 0.70710677, %v260_v28  ;;  %v263_v34 = vadd.f32 %v1045_v24, %v262_v32  ;;  %v322_v63 = vmul.f32 0.5, %v260_v28 }
 0x12f   :  { %826 = verf.f32 %v340_v30  ;;  %v341_v35 = vmul.f32 0.70710677, %v271_v31  ;;  %v325_v58 = vmul.f32 0.5, %v271_v31 }
 0x130   :  { %828 = verf.f32 %v338_v33  ;;  %v339_v36 = vmul.f32 0.70710677, %v263_v34  ;;  %v323_v5 = vmul.f32 0.5, %v263_v34 }
 0x131   :  { %830 = verf.f32 %v341_v35 }
 0x132   :  { %832 = verf.f32 %v339_v36  ;;  %v752_v37 = vpop.f32.mrb[4].mxu0 }
 0x133   :  { %v284_v38 = vadd.f32 %v752_v37, %v1045_v24  ;;  %v275_v39 = vpop.f32.mrb[5].mxu0 }
 0x134   :  { %v276_v40 = vadd.f32 %v1045_v24, %v275_v39  ;;  %v753_v41 = vpop.f32.mrb[6].mxu0 }
 0x135   :  { %v344_v42 = vmul.f32 0.70710677, %v284_v38  ;;  %v287_v43 = vadd.f32 %v753_v41, %v1045_v24  ;;  %v278_v44 = vpop.f32.mrb[7].mxu0  ;;  %v328_v25 = vmul.f32 0.5, %v284_v38 }
 0x136   :  { %v342_v45 = vmul.f32 0.70710677, %v276_v40  ;;  %v279_v46 = vadd.f32 %v1045_v24, %v278_v44  ;;  %v326_v30 = vmul.f32 0.5, %v276_v40 }
 0x137   :  { %834 = verf.f32 %v344_v42  ;;  %v345_v47 = vmul.f32 0.70710677, %v287_v43  ;;  %v329_v26 = vmul.f32 0.5, %v287_v43 }
 0x138   :  { %836 = verf.f32 %v342_v45  ;;  %v343_v48 = vmul.f32 0.70710677, %v279_v46  ;;  %v327_v31 = vmul.f32 0.5, %v279_v46 }
 0x139   :  { %v827_v49 = vpop.eup %826  ;;  %838 = verf.f32 %v345_v47 }
 0x13a   :  { %v829_v50 = vpop.eup %828  ;;  %840 = verf.f32 %v343_v48  ;;  %v756_v51 = vpop.f32.mrb[8].mxu0  ;;  %v372_v54 = vadd.f32 1.0, %v827_v49 }
 0x13b   :  { %v831_v52 = vpop.eup %830  ;;  %v1056_v55 = vadd.f32 %v756_v51, %v1045_v24  ;;  %v291_v56 = vpop.f32.mrb[9].mxu0  ;;  %v370_v62 = vadd.f32 1.0, %v829_v50 }
 0x13c   :  { %v833_v57 = vpop.eup %832  ;;  %v373_v59 = vadd.f32 1.0, %v831_v52  ;;  %v1059_v60 = vadd.f32 %v1045_v24, %v291_v56  ;;  %v757_v61 = vpop.f32.mrb[10].mxu0  ;;  %v388_v8 = vmul.f32 %v372_v54, %v324_v53 }
 0x13d   :  { %v348_v0 = vmul.f32 0.70710677, %v1056_v55  ;;  %v303_v1 = vadd.f32 %v757_v61, %v1045_v24  ;;  %v294_v2 = vpop.f32.mrb[11].mxu0  ;;  %v371_v3 = vadd.f32 1.0, %v833_v57  ;;  %v386_v11 = vmul.f32 %v370_v62, %v322_v63 }
 0x13e   :  { %v389_v4 = vmul.f32 %v373_v59, %v325_v58  ;;  %v346_v6 = vmul.f32 0.70710677, %v1059_v60  ;;  %v295_v7 = vadd.f32 %v1045_v24, %v294_v2  ;;  %v332_v52 = vmul.f32 0.5, %v1056_v55 }
 0x13f   :  { %842 = verf.f32 %v348_v0  ;;  %v349_v9 = vmul.f32 0.70710677, %v303_v1  ;;  %v387_v12 = vmul.f32 %v371_v3, %v323_v5  ;;  %v333_v53 = vmul.f32 0.5, %v303_v1 }
 0x140   :  { %844 = verf.f32 %v346_v6  ;;  %v347_v10 = vmul.f32 0.70710677, %v295_v7  ;;  %v419_v14 = vpack.c.bf16 %v389_v4, %v388_v8  ;;  %v331_v56 = vmul.f32 0.5, %v295_v7 }
 0x141   :  { %v835_v13 = vpop.eup %834  ;;  %846 = verf.f32 %v349_v9  ;;  %v418_v18 = vpack.c.bf16 %v387_v12, %v386_v11 }
 0x142   :  { %v837_v15 = vpop.eup %836  ;;  %v376_v16 = vadd.f32 1.0, %v835_v13  ;;  %848 = verf.f32 %v347_v10  ;;  %v760_v17 = vpop.f32.mrb[12].mxu0 }
 0x143   :  { %v839_v19 = vpop.eup %838  ;;  %v374_v20 = vadd.f32 1.0, %v837_v15  ;;  %v316_v21 = vadd.f32 %v760_v17, %v1045_v24  ;;  %v307_v22 = vpop.f32.mrb[13].mxu0  ;;  %778 = vmatprep.mubr.bf16.mxu1 %v418_v18  ;;  %v672_v17 = vld [vmem:[%s1090_s4] ss:$0 sm:$0xff]  ;;  %s957_s4 = smov [#allocation9]  }
 0x144   :  { %v841_v23 = vpop.eup %840  ;;  %v377_v27 = vadd.f32 1.0, %v839_v19  ;;  %v308_v28 = vadd.f32 %v1045_v24, %v307_v22  ;;  %v761_v29 = vpop.f32.mrb[14].mxu0  ;;  %779 = vmatmul.mubr.bf16.vlgmr.msra.gmra.mrb[0].mxu1 %v419_v14  ;;  %v392_v35 = vmul.f32 %v376_v16, %v328_v25  ;;  %s659_s6 = sshll.u32 %s957_s4, 4  ;;  %s660_s6 = int_to_ptr.vmem [resolvable:$true] %s659_s6 }
 0x145   :  { %v375_v32 = vadd.f32 1.0, %v841_v23  ;;  %v352_v33 = vmul.f32 0.70710677, %v316_v21  ;;  %v310_v34 = vpop.f32.mrb[15].mxu0  ;;  %v319_v39 = vadd.f32 %v761_v29, %v1045_v24  ;;  %v390_v41 = vmul.f32 %v374_v20, %v326_v30  ;;  %s924_s7 = scalar_lea.vmem %s660_s6, 2048  ;;  %p929_p11 = scmp.lt.s32.totalorder %s660_s6, %s660_s6 }
 0x146   :  { %v393_v36 = vmul.f32 %v377_v27, %v329_v26  ;;  %v350_v37 = vmul.f32 0.70710677, %v308_v28  ;;  %v311_v38 = vadd.f32 %v1045_v24, %v310_v34  ;;  %v330_v24 = vmul.f32 0.5, %v1059_v60  ;;  %p925_p10 = scmp.ne.s32.totalorder %s660_s6, %s924_s7  ;;  %p930_p12 = scmp.lt.s32.totalorder %s924_s7, %s924_s7 }
 0x147   :  { %v391_v42 = vmul.f32 %v375_v32, %v327_v31  ;;  %850 = verf.f32 %v352_v33  ;;  %v353_v43 = vmul.f32 0.70710677, %v319_v39  ;;  %v336_v1 = vmul.f32 0.5, %v316_v21 }
 0x148   :  { %852 = verf.f32 %v350_v37  ;;  %v421_v44 = vpack.c.bf16 %v393_v36, %v392_v35  ;;  %v351_v40 = vmul.f32 0.70710677, %v311_v38  ;;  %v337_v8 = vmul.f32 0.5, %v319_v39  ;;  %p931_p13 = por %p930_p12, %p929_p11 }
 0x149   :  { %v843_v45 = vpop.eup %842  ;;  %v420_v46 = vpack.c.bf16 %v391_v42, %v390_v41  ;;  %854 = verf.f32 %v353_v43  ;;  %v334_v60 = vmul.f32 0.5, %v308_v28  ;;  %v335_v7 = vmul.f32 0.5, %v311_v38 }
 0x14a   :  { %v845_v47 = vpop.eup %844  ;;  %v380_v48 = vadd.f32 1.0, %v843_v45  ;;  %856 = verf.f32 %v351_v40  ;;  %p932_p0 = pnand %p931_p13, %p925_p10 }
 0x14b   :  { %v847_v49 = vpop.eup %846  ;;  %v378_v50 = vadd.f32 1.0, %v845_v47  ;;  %782 = vmatprep.mubr.bf16.mxu1 %v420_v46 }
 0x14c   :  { %v849_v51 = vpop.eup %848  ;;  %v381_v54 = vadd.f32 1.0, %v847_v49  ;;  %783 = vmatmul.mubr.bf16.gmra.mrb[4].mxu1 %v421_v44  ;;  %v396_v58 = vmul.f32 %v380_v48, %v332_v52 }
 0x14d   :  { %v379_v57 = vadd.f32 1.0, %v849_v51  ;;  %v394_v61 = vmul.f32 %v378_v50, %v330_v24 }
 0x14e   :  { %v397_v59 = vmul.f32 %v381_v54, %v333_v53 }
 0x14f   :  { %v395_v62 = vmul.f32 %v379_v57, %v331_v56 }
 0x150   :  { %v423_v63 = vpack.c.bf16 %v397_v59, %v396_v58 }
 0x151   :  { %v851_v0 = vpop.eup %850  ;;  %v422_v2 = vpack.c.bf16 %v395_v62, %v394_v61 }
 0x152   :  { %v853_v3 = vpop.eup %852  ;;  %v384_v4 = vadd.f32 1.0, %v851_v0 }
 0x153   :  { %786 = vmatprep.mubr.bf16.mxu1 %v422_v2  ;;  %v855_v5 = vpop.eup %854  ;;  %v382_v6 = vadd.f32 1.0, %v853_v3 }
 0x154   :  { %v857_v55 = vpop.eup %856  ;;  %v385_v9 = vadd.f32 1.0, %v855_v5  ;;  %787 = vmatmul.mubr.bf16.gmra.mrb[8].mxu1 %v423_v63  ;;  %v400_v11 = vmul.f32 %v384_v4, %v336_v1 }
 0x155   :  { %v383_v10 = vadd.f32 1.0, %v857_v55  ;;  %v398_v13 = vmul.f32 %v382_v6, %v334_v60 }
 0x156   :  { %v401_v12 = vmul.f32 %v385_v9, %v337_v8 }
 0x157   :  { %v399_v14 = vmul.f32 %v383_v10, %v335_v7 }
 0x158   :  { %v425_v15 = vpack.c.bf16 %v401_v12, %v400_v11 }
 0x159   :  { %v424_v16 = vpack.c.bf16 %v399_v14, %v398_v13 }
 0x15b   :  { %790 = vmatprep.mubr.bf16.mxu1 %v424_v16 }
 0x15c   :  { %791 = vmatmul.mubr.bf16.gmra.mrb[12].mxu1 %v425_v15 }
 0x217   :  { %v780_v18 = vpop.f32.mrb[0].mxu1 }
 0x218   :  { %v589_v19 = vadd.f32 %v780_v18, %v672_v17  ;;  %v524_v20 = vpop.f32.mrb[1].mxu1 }
 0x219   :  { %v587_v21 = vadd.f32 %v672_v17, %v524_v20  ;;  %v781_v22 = vpop.f32.mrb[2].mxu1 }
 0x21a   :  { %640 = vst [vmem:[#allocation9 + $0x10] sm:$0xff] %v589_v19  ;;  %v590_v23 = vadd.f32 %v781_v22, %v672_v17  ;;  %v527_v25 = vpop.f32.mrb[3].mxu1 }
 0x21b   :  { %638 = vst [vmem:[#allocation9] sm:$0xff] %v587_v21  ;;  %v588_v26 = vadd.f32 %v672_v17, %v527_v25 }
 0x21c   :  { %641 = vst [vmem:[#allocation9 + $0x18] sm:$0xff] %v590_v23 }
 0x21d   :  { %639 = vst [vmem:[#allocation9 + $0x8] sm:$0xff] %v588_v26 }
 0x21f   :  { %v784_v27 = vpop.f32.mrb[4].mxu1 }
 0x220   :  { %v593_v28 = vadd.f32 %v784_v27, %v672_v17  ;;  %v540_v29 = vpop.f32.mrb[5].mxu1 }
 0x221   :  { %v591_v30 = vadd.f32 %v672_v17, %v540_v29  ;;  %v785_v31 = vpop.f32.mrb[6].mxu1 }
 0x222   :  { %644 = vst [vmem:[#allocation9 + $0x30] sm:$0xff] %v593_v28  ;;  %v594_v32 = vadd.f32 %v785_v31, %v672_v17  ;;  %v543_v33 = vpop.f32.mrb[7].mxu1 }
 0x223   :  { %642 = vst [vmem:[#allocation9 + $0x20] sm:$0xff] %v591_v30  ;;  %v592_v34 = vadd.f32 %v672_v17, %v543_v33 }
 0x224   :  { %645 = vst [vmem:[#allocation9 + $0x38] sm:$0xff] %v594_v32 }
 0x225   :  { %643 = vst [vmem:[#allocation9 + $0x28] sm:$0xff] %v592_v34 }
 0x227   :  { %v788_v35 = vpop.f32.mrb[8].mxu1 }
 0x228   :  { %v597_v36 = vadd.f32 %v788_v35, %v672_v17  ;;  %v556_v37 = vpop.f32.mrb[9].mxu1 }
 0x229   :  { %v595_v39 = vadd.f32 %v672_v17, %v556_v37  ;;  %v789_v41 = vpop.f32.mrb[10].mxu1 }
 0x22a   :  { %648 = vst [vmem:[#allocation9 + $0x50] sm:$0xff] %v597_v36  ;;  %v598_v42 = vadd.f32 %v789_v41, %v672_v17  ;;  %v559_v38 = vpop.f32.mrb[11].mxu1 }
 0x22b   :  { %646 = vst [vmem:[#allocation9 + $0x40] sm:$0xff] %v595_v39  ;;  %v596_v43 = vadd.f32 %v672_v17, %v559_v38 }
 0x22c   :  { %649 = vst [vmem:[#allocation9 + $0x58] sm:$0xff] %v598_v42 }
 0x22d   :  { %647 = vst [vmem:[#allocation9 + $0x48] sm:$0xff] %v596_v43 }
 0x22f   :  { %v792_v44 = vpop.f32.mrb[12].mxu1 }
 0x230   :  { %v601_v45 = vadd.f32 %v792_v44, %v672_v17  ;;  %v572_v40 = vpop.f32.mrb[13].mxu1 }
 0x231   :  { %v599_v46 = vadd.f32 %v672_v17, %v572_v40  ;;  %v793_v47 = vpop.f32.mrb[14].mxu1 }
 0x232   :  { %652 = vst [vmem:[#allocation9 + $0x70] sm:$0xff] %v601_v45  ;;  %v602_v48 = vadd.f32 %v793_v47, %v672_v17  ;;  %v575_v49 = vpop.f32.mrb[15].mxu1 }
 0x233   :  { %650 = vst [vmem:[#allocation9 + $0x60] sm:$0xff] %v599_v46  ;;  %v600_v50 = vadd.f32 %v672_v17, %v575_v49 }
 0x234   :  { %653 = vst [vmem:[#allocation9 + $0x78] sm:$0xff] %v602_v48 }
 0x235   :  { %651 = vst [vmem:[#allocation9 + $0x68] sm:$0xff] %v600_v50 }
 0x236   :  { %935 = shalt.err (!%p932_p0)
}
 0x237   :  { %s936_s10 = scalar_lea.hbm %s1091_s5, 2048 }
 0x238   :  { %p937_p1 = scmp.ne.s32.totalorder %s1091_s5, %s936_s10  ;;  %p940_p2 = scmp.lt.u32.totalorder %s936_s10, %s1091_s5 }
 0x23a   :  { %p942_p3 = pnand %p940_p2, %p937_p1 }
 0x23c   :  { %945 = shalt.err (!%p942_p3)
}
 0x23d   :  { %s958_s15 = smov 128   ;;  %s959_s16 = smov 8  }
 0x23e   :  { %665 = dma.vmem_to_hbm [thread:$0]  %s660_s6, 2048, %s1091_s5, [#allocation5], %s958_s15, %s958_s15, %s959_s16  }
 0x23f   :  { %950 = dma.done.wait [#allocation5], 2048  }
 0x240   :  { %951 = vsyncadd [#allocation5], 4294965248 }
 0x241   :  { %669 = vsyncpa [#allocation4], 1 }
 0x242   :  { %670 = vsyncpa [#allocation7], 1 }
 0x243   :  { %671 = vsyncpa [#allocation5], 1 }

</bundles_post_ra>
